<compile_context>
chip_gen: v7x
topology: tpu7x:2x2x1
jax: 0.10.0
libtpu: 0.0.40
codegen_flags: <defaults>
</compile_context>

<pallas_src>
import functools

import jax
import jax.numpy as jnp
from jax.experimental import pallas as pl
from jax.experimental.pallas import tpu as pltpu


def _round_up(x, m):
    return (x + m - 1) // m * m


def _pick_budget():
    """(tile_b_max, vmem_limit_bytes) per TPU generation."""
    try:
        info = pltpu.get_tpu_info()
        vmem_bytes = getattr(info, "vmem_capacity_bytes", None)
    except Exception:  # pragma: no cover - conservative fallback off-TPU/older jax
        vmem_bytes = None
    if vmem_bytes is not None and vmem_bytes >= 96 * 1024 * 1024:
        # v5e / v6e: 128 MiB physical VMEM -> big tiles amortize per-step overhead.
        return 8192, 64 * 1024 * 1024
    if vmem_bytes is not None:
        # v7x: 64 MiB physical VMEM -> cap tiles, leave headroom for scratch.
        return 2048, 40 * 1024 * 1024
    # Unknown: safe everywhere (fits default scoped VMEM comfortably).
    return 2048, 32 * 1024 * 1024


def _choose_tiling(batch, tile_b_max):
    """Sublane-aligned tile size with minimal padding and >=2/4 grid steps."""
    b8 = _round_up(max(batch, 1), 8)
    n_tiles = pl.cdiv(b8, tile_b_max)
    if b8 >= 2 * 512:
        n_tiles = max(n_tiles, 2)   # keep both v7x TensorCores busy
    if b8 >= 4 * 1024:
        n_tiles = max(n_tiles, 4)   # per-core double-buffer overlap headroom
    tile_b = _round_up(pl.cdiv(b8, n_tiles), 8)
    padded_b = tile_b * n_tiles
    return tile_b, padded_b


def _mlp_ae_kernel(x_ref,
                   w1_ref, b1_ref, w2_ref, b2_ref, w3_ref, b3_ref,
                   w4_ref, b4_ref, w5_ref, b5_ref, w6_ref, b6_ref,
                   o_ref):
    """One batch tile of the MLP autoencoder; weights stay VMEM-resident."""
    # Cast to bf16 in-kernel (input streamed from HBM as f32 -> no wrapper pass;
    # bf16 x bf16 keeps the big MXU matmuls single-pass, accumulation is f32).
    x = x_ref[...].astype(jnp.bfloat16)              # (TILE_B, feat)

    # Hoist bias loads (read each bias exactly once; JAX won't CSE broadcasts).
    b1 = b1_ref[...]; b2 = b2_ref[...]; b3 = b3_ref[...]
    b4 = b4_ref[...]; b5 = b5_ref[...]; b6 = b6_ref[...]

    # ---- encoder: Linear(in,32) ReLU Linear(32,16) ReLU Linear(16,latent) ----
    h = jnp.maximum(jnp.dot(x, w1_ref[...], preferred_element_type=jnp.float32) + b1, 0.0)
    h = jnp.maximum(jnp.dot(h, w2_ref[...], preferred_element_type=jnp.float32) + b2, 0.0)
    z = jnp.dot(h, w3_ref[...], preferred_element_type=jnp.float32) + b3   # latent (no act)

    # ---- decoder: Linear(latent,16) ReLU Linear(16,32) ReLU Linear(32,in) Sigmoid
    h = jnp.maximum(jnp.dot(z, w4_ref[...], preferred_element_type=jnp.float32) + b4, 0.0)
    h = jnp.maximum(jnp.dot(h, w5_ref[...], preferred_element_type=jnp.float32) + b5, 0.0)
    y = jnp.dot(h.astype(jnp.bfloat16), w6_ref[...],
                preferred_element_type=jnp.float32) + b6

    # sigmoid(y) = 0.5*tanh(0.5*y) + 0.5 : single EUP op, strictly in [0, 1].
    o_ref[...] = 0.5 * jnp.tanh(0.5 * y) + 0.5


def autoencoder_forward(x_nchw, params):
    """x_nchw: (B, 1, H, W) float32. Returns (B, 1, H, W) float32."""
    B, C, H, W = x_nchw.shape
    assert C == 1
    input_dim = H * W
    x_flat = x_nchw.reshape(B, input_dim)                      # x.view(len(x), -1)

    (w1, b1), (w2, b2), (w3, b3), (w4, b4), (w5, b5), (w6, b6) = params

    # Keep the streamed feature dim lane-dense (multiple of 128); zero-pad
    # w1 rows / w6,b6 columns if H*W is not already aligned (256 -> no-op).
    feat = _round_up(input_dim, 128)
    if feat != input_dim:
        pad = feat - input_dim
        x_flat = jnp.pad(x_flat, ((0, 0), (0, pad)))
        w1 = jnp.pad(w1, ((0, pad), (0, 0)))
        w6 = jnp.pad(w6, ((0, 0), (0, pad)))
        b6 = jnp.pad(b6, ((0, 0), (0, pad)))

    # Only the VMEM-resident big weights are pre-cast to bf16 (one-off, tiny);
    # the HBM-streamed input stays f32 and is cast inside the kernel.
    w1 = w1.astype(jnp.bfloat16)
    w6 = w6.astype(jnp.bfloat16)

    tile_b_max, vmem_limit = _pick_budget()
    tile_b, padded_b = _choose_tiling(B, tile_b_max)
    if padded_b != B:
        x_flat = jnp.pad(x_flat, ((0, padded_b - B), (0, 0)))
    grid = (padded_b // tile_b,)

    def const_map(i):          # weights/biases: DMA'd once, VMEM-resident
        return (0, 0)

    weights = [w1, b1, w2, b2, w3, b3, w4, b4, w5, b5, w6, b6]
    w_specs = [pl.BlockSpec(p.shape, const_map) for p in weights]
    x_spec = pl.BlockSpec((tile_b, feat), lambda i: (i, 0))
    out_spec = pl.BlockSpec((tile_b, feat), lambda i: (i, 0))

    out_flat = pl.pallas_call(
        _mlp_ae_kernel,
        out_shape=jax.ShapeDtypeStruct((padded_b, feat), jnp.float32),
        grid=grid,
        in_specs=[x_spec] + w_specs,
        out_specs=out_spec,
        compiler_params=pltpu.CompilerParams(
            dimension_semantics=("parallel",),      # megacore sharding on v7x
            vmem_limit_bytes=vmem_limit,
        ),
    )(x_flat, *weights)

    out = out_flat[:B, :input_dim]
    return out.reshape(B, 1, H, W)                  # x.view(len(x), 1, h, w)


def reference_forward(x_nchw, params):
    """Pure-JAX f32 reference matching the PyTorch module."""
    B, C, H, W = x_nchw.shape
    x = x_nchw.reshape(B, H * W)
    (w1, b1), (w2, b2), (w3, b3), (w4, b4), (w5, b5), (w6, b6) = params
    h = jax.nn.relu(x @ w1 + b1)
    h = jax.nn.relu(h @ w2 + b2)
    z = h @ w3 + b3
    h = jax.nn.relu(z @ w4 + b4)
    h = jax.nn.relu(h @ w5 + b5)
    y = jax.nn.sigmoid(h @ w6 + b6)
    return y.reshape(B, 1, H, W)


def init_params(key, input_dim, latent_dim):
    """Deterministic init matching nn.Linear shapes (weights stored as (in, out))."""
    dims = [(input_dim, 32), (32, 16), (16, latent_dim),        # encoder
            (latent_dim, 16), (16, 32), (32, input_dim)]        # decoder
    params = []
    for i, (fan_in, fan_out) in enumerate(dims):
        kw, kb = jax.random.split(jax.random.fold_in(key, i))
        bound = 1.0 / jnp.sqrt(fan_in)
        w = jax.random.uniform(kw, (fan_in, fan_out), jnp.float32, -bound, bound)
        b = jax.random.uniform(kb, (1, fan_out), jnp.float32, -bound, bound)
        params.append((w, b))
    return params


if __name__ == "__main__":
    # Small shapes consistent with the MLP archetype of the module.
    B, H, W = 2, 16, 16
    latent_dim = 8
    input_dim = H * W

    key = jax.random.PRNGKey(0)
    k_x, k_p = jax.random.split(key)
    x = jax.random.uniform(k_x, (B, 1, H, W), jnp.float32)      # NCHW, like PyTorch
    params = init_params(k_p, input_dim, latent_dim)

    # TODO(synk): the conv archetype (Conv2d/MaxPool2d/ConvTranspose2d path) is
    # not implemented here; only the MLP archetype forward is kernelized.
    fwd = jax.jit(functools.partial(autoencoder_forward, params=params))
    out = fwd(x)
    jax.block_until_ready(out)

    assert out.shape == (B, 1, H, W), out.shape
    assert out.dtype == jnp.float32
    # Sigmoid range (tanh form is bounded; tiny slack for float rounding).
    assert bool(jnp.all((out >= -1e-6) & (out <= 1.0 + 1e-6)))
    ref = reference_forward(x, params)
    max_err = float(jnp.max(jnp.abs(out - ref)))
    assert max_err < 2e-2, f"max_err={max_err}"
    print("KERNEL_OK")
</pallas_src>

<mosaic_0001>
module attributes {stable_mosaic.version = 11 : i64} {
  func.func @_mlp_ae_kernel(%arg0: i32, %arg1: memref<8x256xf32, #tpu.memory_space<vmem>>, %arg2: memref<256x32xbf16, #tpu.memory_space<vmem>>, %arg3: memref<1x32xf32, #tpu.memory_space<vmem>>, %arg4: memref<32x16xf32, #tpu.memory_space<vmem>>, %arg5: memref<1x16xf32, #tpu.memory_space<vmem>>, %arg6: memref<16x8xf32, #tpu.memory_space<vmem>>, %arg7: memref<1x8xf32, #tpu.memory_space<vmem>>, %arg8: memref<8x16xf32, #tpu.memory_space<vmem>>, %arg9: memref<1x16xf32, #tpu.memory_space<vmem>>, %arg10: memref<16x32xf32, #tpu.memory_space<vmem>>, %arg11: memref<1x32xf32, #tpu.memory_space<vmem>>, %arg12: memref<32x256xbf16, #tpu.memory_space<vmem>>, %arg13: memref<1x256xf32, #tpu.memory_space<vmem>>, %arg14: memref<8x256xf32, #tpu.memory_space<vmem>>) attributes {dimension_semantics = [#tpu.dimension_semantics<parallel>], iteration_bounds = array<i64: 1>, scalar_prefetch = 0 : i64, scratch_operands = 0 : i64, tpu.core_type = #tpu.core_type<tc>, window_params = [{transform_indices = @transform_0, window_bounds = array<i64: 8, 256>}, {pipeline_mode = #tpu.pipeline_mode<synchronous>, transform_indices = @transform_1, window_bounds = array<i64: 256, 32>}, {pipeline_mode = #tpu.pipeline_mode<synchronous>, transform_indices = @transform_2, window_bounds = array<i64: 1, 32>}, {pipeline_mode = #tpu.pipeline_mode<synchronous>, transform_indices = @transform_3, window_bounds = array<i64: 32, 16>}, {pipeline_mode = #tpu.pipeline_mode<synchronous>, transform_indices = @transform_4, window_bounds = array<i64: 1, 16>}, {pipeline_mode = #tpu.pipeline_mode<synchronous>, transform_indices = @transform_5, window_bounds = array<i64: 16, 8>}, {pipeline_mode = #tpu.pipeline_mode<synchronous>, transform_indices = @transform_6, window_bounds = array<i64: 1, 8>}, {pipeline_mode = #tpu.pipeline_mode<synchronous>, transform_indices = @transform_7, window_bounds = array<i64: 8, 16>}, {pipeline_mode = #tpu.pipeline_mode<synchronous>, transform_indices = @transform_8, window_bounds = array<i64: 1, 16>}, {pipeline_mode = #tpu.pipeline_mode<synchronous>, transform_indices = @transform_9, window_bounds = array<i64: 16, 32>}, {pipeline_mode = #tpu.pipeline_mode<synchronous>, transform_indices = @transform_10, window_bounds = array<i64: 1, 32>}, {pipeline_mode = #tpu.pipeline_mode<synchronous>, transform_indices = @transform_11, window_bounds = array<i64: 32, 256>}, {pipeline_mode = #tpu.pipeline_mode<synchronous>, transform_indices = @transform_12, window_bounds = array<i64: 1, 256>}, {transform_indices = @transform_13, window_bounds = array<i64: 8, 256>}]} {
    %c0 = arith.constant 0 : index
    %c0_0 = arith.constant 0 : index
    %0 = vector.load %arg1[%c0, %c0_0] : memref<8x256xf32, #tpu.memory_space<vmem>>, vector<8x256xf32>
    %1 = arith.truncf %0 : vector<8x256xf32> to vector<8x256xbf16>
    %c0_1 = arith.constant 0 : index
    %c0_2 = arith.constant 0 : index
    %2 = vector.load %arg3[%c0_1, %c0_2] : memref<1x32xf32, #tpu.memory_space<vmem>>, vector<1x32xf32>
    %c0_3 = arith.constant 0 : index
    %c0_4 = arith.constant 0 : index
    %3 = vector.load %arg5[%c0_3, %c0_4] : memref<1x16xf32, #tpu.memory_space<vmem>>, vector<1x16xf32>
    %c0_5 = arith.constant 0 : index
    %c0_6 = arith.constant 0 : index
    %4 = vector.load %arg7[%c0_5, %c0_6] : memref<1x8xf32, #tpu.memory_space<vmem>>, vector<1x8xf32>
    %c0_7 = arith.constant 0 : index
    %c0_8 = arith.constant 0 : index
    %5 = vector.load %arg9[%c0_7, %c0_8] : memref<1x16xf32, #tpu.memory_space<vmem>>, vector<1x16xf32>
    %c0_9 = arith.constant 0 : index
    %c0_10 = arith.constant 0 : index
    %6 = vector.load %arg11[%c0_9, %c0_10] : memref<1x32xf32, #tpu.memory_space<vmem>>, vector<1x32xf32>
    %c0_11 = arith.constant 0 : index
    %c0_12 = arith.constant 0 : index
    %7 = vector.load %arg13[%c0_11, %c0_12] : memref<1x256xf32, #tpu.memory_space<vmem>>, vector<1x256xf32>
    %c0_13 = arith.constant 0 : index
    %c0_14 = arith.constant 0 : index
    %8 = vector.load %arg2[%c0_13, %c0_14] : memref<256x32xbf16, #tpu.memory_space<vmem>>, vector<256x32xbf16>
    %cst = arith.constant dense<0.000000e+00> : vector<8x32xf32>
    %9 = tpu.matmul %1, %8, %cst {dimension_numbers = #tpu.dot_dimension_numbers<[1], [0], [0], [1], [0, 0, 1, 1], [], []>} : vector<8x256xbf16>, vector<256x32xbf16>, vector<8x32xf32> -> vector<8x32xf32>
    %10 = vector.broadcast %2 : vector<1x32xf32> to vector<8x32xf32>
    %11 = arith.addf %9, %10 : vector<8x32xf32>
    %cst_15 = arith.constant 0.000000e+00 : f32
    %12 = vector.broadcast %cst_15 : f32 to vector<8x32xf32>
    %13 = arith.maximumf %11, %12 : vector<8x32xf32>
    %c0_16 = arith.constant 0 : index
    %c0_17 = arith.constant 0 : index
    %14 = vector.load %arg4[%c0_16, %c0_17] : memref<32x16xf32, #tpu.memory_space<vmem>>, vector<32x16xf32>
    %cst_18 = arith.constant dense<0.000000e+00> : vector<8x16xf32>
    %15 = tpu.matmul %13, %14, %cst_18 {dimension_numbers = #tpu.dot_dimension_numbers<[1], [0], [0], [1], [0, 0, 1, 1], [], []>} : vector<8x32xf32>, vector<32x16xf32>, vector<8x16xf32> -> vector<8x16xf32>
    %16 = vector.broadcast %3 : vector<1x16xf32> to vector<8x16xf32>
    %17 = arith.addf %15, %16 : vector<8x16xf32>
    %cst_19 = arith.constant 0.000000e+00 : f32
    %18 = vector.broadcast %cst_19 : f32 to vector<8x16xf32>
    %19 = arith.maximumf %17, %18 : vector<8x16xf32>
    %c0_20 = arith.constant 0 : index
    %c0_21 = arith.constant 0 : index
    %20 = vector.load %arg6[%c0_20, %c0_21] : memref<16x8xf32, #tpu.memory_space<vmem>>, vector<16x8xf32>
    %cst_22 = arith.constant dense<0.000000e+00> : vector<8x8xf32>
    %21 = tpu.matmul %19, %20, %cst_22 {dimension_numbers = #tpu.dot_dimension_numbers<[1], [0], [0], [1], [0, 0, 1, 1], [], []>} : vector<8x16xf32>, vector<16x8xf32>, vector<8x8xf32> -> vector<8x8xf32>
    %22 = vector.broadcast %4 : vector<1x8xf32> to vector<8x8xf32>
    %23 = arith.addf %21, %22 : vector<8x8xf32>
    %c0_23 = arith.constant 0 : index
    %c0_24 = arith.constant 0 : index
    %24 = vector.load %arg8[%c0_23, %c0_24] : memref<8x16xf32, #tpu.memory_space<vmem>>, vector<8x16xf32>
    %cst_25 = arith.constant dense<0.000000e+00> : vector<8x16xf32>
    %25 = tpu.matmul %23, %24, %cst_25 {dimension_numbers = #tpu.dot_dimension_numbers<[1], [0], [0], [1], [0, 0, 1, 1], [], []>} : vector<8x8xf32>, vector<8x16xf32>, vector<8x16xf32> -> vector<8x16xf32>
    %26 = vector.broadcast %5 : vector<1x16xf32> to vector<8x16xf32>
    %27 = arith.addf %25, %26 : vector<8x16xf32>
    %cst_26 = arith.constant 0.000000e+00 : f32
    %28 = vector.broadcast %cst_26 : f32 to vector<8x16xf32>
    %29 = arith.maximumf %27, %28 : vector<8x16xf32>
    %c0_27 = arith.constant 0 : index
    %c0_28 = arith.constant 0 : index
    %30 = vector.load %arg10[%c0_27, %c0_28] : memref<16x32xf32, #tpu.memory_space<vmem>>, vector<16x32xf32>
    %cst_29 = arith.constant dense<0.000000e+00> : vector<8x32xf32>
    %31 = tpu.matmul %29, %30, %cst_29 {dimension_numbers = #tpu.dot_dimension_numbers<[1], [0], [0], [1], [0, 0, 1, 1], [], []>} : vector<8x16xf32>, vector<16x32xf32>, vector<8x32xf32> -> vector<8x32xf32>
    %32 = vector.broadcast %6 : vector<1x32xf32> to vector<8x32xf32>
    %33 = arith.addf %31, %32 : vector<8x32xf32>
    %cst_30 = arith.constant 0.000000e+00 : f32
    %34 = vector.broadcast %cst_30 : f32 to vector<8x32xf32>
    %35 = arith.maximumf %33, %34 : vector<8x32xf32>
    %36 = arith.truncf %35 : vector<8x32xf32> to vector<8x32xbf16>
    %c0_31 = arith.constant 0 : index
    %c0_32 = arith.constant 0 : index
    %37 = vector.load %arg12[%c0_31, %c0_32] : memref<32x256xbf16, #tpu.memory_space<vmem>>, vector<32x256xbf16>
    %cst_33 = arith.constant dense<0.000000e+00> : vector<8x256xf32>
    %38 = tpu.matmul %36, %37, %cst_33 {dimension_numbers = #tpu.dot_dimension_numbers<[1], [0], [0], [1], [0, 0, 1, 1], [], []>} : vector<8x32xbf16>, vector<32x256xbf16>, vector<8x256xf32> -> vector<8x256xf32>
    %39 = vector.broadcast %7 : vector<1x256xf32> to vector<8x256xf32>
    %40 = arith.addf %38, %39 : vector<8x256xf32>
    %cst_34 = arith.constant 5.000000e-01 : f32
    %41 = vector.broadcast %cst_34 : f32 to vector<8x256xf32>
    %42 = arith.mulf %41, %40 : vector<8x256xf32>
    %43 = math.tanh %42 : vector<8x256xf32>
    %cst_35 = arith.constant 5.000000e-01 : f32
    %44 = vector.broadcast %cst_35 : f32 to vector<8x256xf32>
    %45 = arith.mulf %44, %43 : vector<8x256xf32>
    %cst_36 = arith.constant 5.000000e-01 : f32
    %46 = vector.broadcast %cst_36 : f32 to vector<8x256xf32>
    %47 = arith.addf %45, %46 : vector<8x256xf32>
    %c0_37 = arith.constant 0 : index
    %c0_38 = arith.constant 0 : index
    %48 = vector.load %arg14[%c0_37, %c0_38] : memref<8x256xf32, #tpu.memory_space<vmem>>, vector<8x256xf32>
    tpu.vector_store %arg14[%c0_37, %c0_38], %47 {strides = array<i32>} : memref<8x256xf32, #tpu.memory_space<vmem>>, vector<8x256xf32>,
    return
  }
  func.func @transform_0(%arg0: i32) -> (i32, i32) {
    %c0_i32 = arith.constant 0 : i32
    %c0_i32_0 = arith.constant 0 : i32
    return %arg0, %c0_i32 : i32, i32
  }
  func.func @transform_1(%arg0: i32) -> (i32, i32) {
    %c0_i32 = arith.constant 0 : i32
    %c0_i32_0 = arith.constant 0 : i32
    %c0_i32_1 = arith.constant 0 : i32
    return %c0_i32, %c0_i32_0 : i32, i32
  }
  func.func @transform_2(%arg0: i32) -> (i32, i32) {
    %c0_i32 = arith.constant 0 : i32
    %c0_i32_0 = arith.constant 0 : i32
    %c0_i32_1 = arith.constant 0 : i32
    return %c0_i32, %c0_i32_0 : i32, i32
  }
  func.func @transform_3(%arg0: i32) -> (i32, i32) {
    %c0_i32 = arith.constant 0 : i32
    %c0_i32_0 = arith.constant 0 : i32
    %c0_i32_1 = arith.constant 0 : i32
    return %c0_i32, %c0_i32_0 : i32, i32
  }
  func.func @transform_4(%arg0: i32) -> (i32, i32) {
    %c0_i32 = arith.constant 0 : i32
    %c0_i32_0 = arith.constant 0 : i32
    %c0_i32_1 = arith.constant 0 : i32
    return %c0_i32, %c0_i32_0 : i32, i32
  }
  func.func @transform_5(%arg0: i32) -> (i32, i32) {
    %c0_i32 = arith.constant 0 : i32
    %c0_i32_0 = arith.constant 0 : i32
    %c0_i32_1 = arith.constant 0 : i32
    return %c0_i32, %c0_i32_0 : i32, i32
  }
  func.func @transform_6(%arg0: i32) -> (i32, i32) {
    %c0_i32 = arith.constant 0 : i32
    %c0_i32_0 = arith.constant 0 : i32
    %c0_i32_1 = arith.constant 0 : i32
    return %c0_i32, %c0_i32_0 : i32, i32
  }
  func.func @transform_7(%arg0: i32) -> (i32, i32) {
    %c0_i32 = arith.constant 0 : i32
    %c0_i32_0 = arith.constant 0 : i32
    %c0_i32_1 = arith.constant 0 : i32
    return %c0_i32, %c0_i32_0 : i32, i32
  }
  func.func @transform_8(%arg0: i32) -> (i32, i32) {
    %c0_i32 = arith.constant 0 : i32
    %c0_i32_0 = arith.constant 0 : i32
    %c0_i32_1 = arith.constant 0 : i32
    return %c0_i32, %c0_i32_0 : i32, i32
  }
  func.func @transform_9(%arg0: i32) -> (i32, i32) {
    %c0_i32 = arith.constant 0 : i32
    %c0_i32_0 = arith.constant 0 : i32
    %c0_i32_1 = arith.constant 0 : i32
    return %c0_i32, %c0_i32_0 : i32, i32
  }
  func.func @transform_10(%arg0: i32) -> (i32, i32) {
    %c0_i32 = arith.constant 0 : i32
    %c0_i32_0 = arith.constant 0 : i32
    %c0_i32_1 = arith.constant 0 : i32
    return %c0_i32, %c0_i32_0 : i32, i32
  }
  func.func @transform_11(%arg0: i32) -> (i32, i32) {
    %c0_i32 = arith.constant 0 : i32
    %c0_i32_0 = arith.constant 0 : i32
    %c0_i32_1 = arith.constant 0 : i32
    return %c0_i32, %c0_i32_0 : i32, i32
  }
  func.func @transform_12(%arg0: i32) -> (i32, i32) {
    %c0_i32 = arith.constant 0 : i32
    %c0_i32_0 = arith.constant 0 : i32
    %c0_i32_1 = arith.constant 0 : i32
    return %c0_i32, %c0_i32_0 : i32, i32
  }
  func.func @transform_13(%arg0: i32) -> (i32, i32) {
    %c0_i32 = arith.constant 0 : i32
    %c0_i32_0 = arith.constant 0 : i32
    return %arg0, %c0_i32 : i32, i32
  }
}

</mosaic_0001>

<bundles_post_ra>
// kernel: autoencoder_forward.1
= control target key start
LH: loop header
LB: loop body
LE: loop exit
PB: predicated region body
PF: predicated region fallthrough
CT: control target
= control target key end

     0   :  { %18 = vsyncpa [#allocation3], 0  ;;  %s1139_s0 = inlined_call_operand.vmem [shape: f32[8,256], index: 0, kind: input, shape index: {}]   ;;  %s1140_s1 = inlined_call_operand.vmem [shape: bf16[256,32], index: 1, kind: input, shape index: {}]   ;;  %s1141_s2 = inlined_call_operand.hbm [shape: f32[1,32], index: 2, kind: input, shape index: {}]   ;;  %s1142_s3 = inlined_call_operand.vmem [shape: f32[32,16], index: 3, kind: input, shape index: {}]   ;;  %s1143_s4 = inlined_call_operand.vmem [shape: f32[1,16], index: 4, kind: input, shape index: {}]   ;;  %s1144_s5 = inlined_call_operand.hbm [shape: f32[16,8], index: 5, kind: input, shape index: {}]   ;;  %s1145_s6 = inlined_call_operand.vmem [shape: f32[1,8], index: 6, kind: input, shape index: {}]   ;;  %s1146_s7 = inlined_call_operand.vmem [shape: f32[8,16], index: 7, kind: input, shape index: {}]   ;;  %s1147_s8 = inlined_call_operand.vmem [shape: f32[1,16], index: 8, kind: input, shape index: {}]   ;;  %s1148_s9 = inlined_call_operand.hbm [shape: f32[16,32], index: 9, kind: input, shape index: {}]   ;;  %s1149_s10 = inlined_call_operand.vmem [shape: f32[1,32], index: 10, kind: input, shape index: {}]   ;;  %s1150_s11 = inlined_call_operand.vmem [shape: bf16[32,256], index: 11, kind: input, shape index: {}]   ;;  %s1151_s12 = inlined_call_operand.vmem [shape: f32[1,256], index: 12, kind: input, shape index: {}]   ;;  %s1152_s13 = inlined_call_operand.vmem [shape: f32[8,256], index: 13, kind: output, shape index: {}]  }
   0x1   :  { %19 = vsyncpa [#allocation5], 0  ;;  %s908_s25 = smov [#allocation4]   ;;  %s838_s29 = scalar_lea.hbm %s1144_s5, 256 }
   0x2   :  { %s43_s26 = sshll.u32 %s908_s25, 4  ;;  %p839_p0 = scmp.ne.s32.totalorder %s1144_s5, %s838_s29  ;;  %s44_s26 = int_to_ptr.vmem [resolvable:$true] %s43_s26 }
   0x3   :  { %p842_p1 = scmp.lt.u32.totalorder %s838_s29, %s1144_s5 }
   0x5   :  { %p844_p2 = pnand %p842_p1, %p839_p0 }
   0x7   :  { %847 = shalt.err (!%p844_p2)
}
   0x8   :  { %s848_s17 = scalar_lea.vmem %s44_s26, 256  ;;  %p853_p4 = scmp.lt.s32.totalorder %s44_s26, %s44_s26 }
   0x9   :  { %p849_p3 = scmp.ne.s32.totalorder %s44_s26, %s848_s17  ;;  %p854_p5 = scmp.lt.s32.totalorder %s848_s17, %s848_s17 }
   0xb   :  { %p855_p6 = por %p854_p5, %p853_p4 }
   0xd   :  { %p856_p7 = pnand %p855_p6, %p849_p3 }
   0xf   :  { %859 = shalt.err (!%p856_p7)
}
  0x10   :  { %s909_s18 = smov 128   ;;  %s910_s19 = smov 8  }
  0x11   :  { %49 = dma.hbm_to_vmem [thread:$0]  %s1144_s5, 256, %s44_s26, [#allocation5], %s909_s18, %s909_s18, %s910_s19  }
  0x12   :  { %s911_s22 = smov [#allocation2]   ;;  %s912_s24 = smov [#allocation6]  }
  0x13   :  { %s30_s23 = sshll.u32 %s911_s22, 4  ;;  %s61_s25 = sshll.u32 %s912_s24, 4  ;;  %s31_s23 = int_to_ptr.vmem [resolvable:$true] %s30_s23  ;;  %s62_s25 = int_to_ptr.vmem [resolvable:$true] %s61_s25 }
  0x14   :  { %s860_s29 = scalar_lea.hbm %s1141_s2, 16 }
  0x15   :  { %p861_p8 = scmp.ne.s32.totalorder %s1141_s2, %s860_s29  ;;  %p864_p9 = scmp.lt.u32.totalorder %s860_s29, %s1141_s2 }
  0x17   :  { %p866_p10 = pnand %p864_p9, %p861_p8 }
  0x19   :  { %869 = shalt.err (!%p866_p10)
}
  0x1a   :  { %s870_s5 = scalar_lea.vmem %s31_s23, 16  ;;  %s874_s26 = scalar_lea.vmem %s31_s23, 32 }
  0x1b   :  { %p871_p11 = scmp.ne.s32.totalorder %s31_s23, %s870_s5  ;;  %p875_p12 = scmp.lt.s32.totalorder %s31_s23, %s31_s23 }
  0x1c   :  { %p876_p13 = scmp.lt.s32.totalorder %s874_s26, %s870_s5 }
  0x1e   :  { %p877_p0 = por %p876_p13, %p875_p12 }
  0x20   :  { %p878_p1 = pnand %p877_p0, %p871_p11 }
  0x22   :  { %881 = shalt.err (!%p878_p1)
}
  0x23   :  { %33 = dma.hbm_to_vmem [thread:$0]  %s1141_s2, 16, %s31_s23, [#allocation3]  }
  0x24   :  { %s882_s24 = scalar_lea.hbm %s1148_s9, 256 }
  0x25   :  { %p883_p2 = scmp.ne.s32.totalorder %s1148_s9, %s882_s24  ;;  %p886_p3 = scmp.lt.u32.totalorder %s882_s24, %s1148_s9 }
  0x27   :  { %p888_p4 = pnand %p886_p3, %p883_p2 }
  0x29   :  { %891 = shalt.err (!%p888_p4)
}
  0x2a   :  { %s892_s14 = scalar_lea.vmem %s62_s25, 256  ;;  %p897_p6 = scmp.lt.s32.totalorder %s62_s25, %s62_s25 }
  0x2b   :  { %p893_p5 = scmp.ne.s32.totalorder %s62_s25, %s892_s14  ;;  %p898_p7 = scmp.lt.s32.totalorder %s892_s14, %s892_s14 }
  0x2d   :  { %p899_p8 = por %p898_p7, %p897_p6 }
  0x2f   :  { %p900_p9 = pnand %p899_p8, %p893_p5 }
  0x31   :  { %903 = shalt.err (!%p900_p9)
}
  0x32   :  { %67 = dma.hbm_to_vmem [thread:$0]  %s1148_s9, 256, %s62_s25, [#allocation5], %s909_s18, %s909_s18, %s910_s19  }
  0x33   :  { %904 = dma.done.wait [#allocation3], 16  }
  0x34   :  { %905 = vsyncadd [#allocation3], 4294967280 }
  0x35   :  { %906 = dma.done.wait [#allocation5], 512  }
  0x36   :  { %907 = vsyncadd [#allocation5], 4294966784  ;;  %v812_v0 = vld [vmem:[%s1140_s1 + $0x40] sm:$0xff]   ;;  %v814_v2 = vld [vmem:[%s1140_s1 + $0x48] sm:$0xff]   ;;  %v913_v23 = vmov 0.0|0.0   ;;  %vm914_vm0 = vmmov 0  }
  0x37   :  { %v813_v1 = vld [vmem:[%s1140_s1] sm:$0xff]   ;;  %726 = vmatprep.subr.bf16.mxu0 %v812_v0  ;;  %v815_v3 = vld [vmem:[%s1140_s1 + $0x8] sm:$0xff]   ;;  %v816_v4 = vld [vmem:[%s1140_s1 + $0x50] sm:$0xff]   ;;  %791 = vmatprep.subr.bf16.mxu1 %v913_v23  ;;  %v915_v27 = vmov 0.0   ;;  %vm279_vm1 = vcmask 261120   ;;  %vm362_vm2 = vcmask 130048  }
  0x38   :  { %727 = vmatpush3.bf16.msra.mxu0 %v813_v1  ;;  %v817_v5 = vld [vmem:[%s1140_s1 + $0x10] sm:$0xff]   ;;  %v818_v6 = vld [vmem:[%s1140_s1 + $0x58] sm:$0xff]   ;;  %v820_v8 = vld [vmem:[%s1140_s1 + $0x60] sm:$0xff]   ;;  %769 = vmatprep.mubr.msk.f32.mxu1 %vm914_vm0, %v915_v27  ;;  %vm443_vm3 = vcmask 64512   ;;  %v916_v61 = vmov 0  }
  0x39   :  { %728 = vmatprep.subr.bf16.mxu0 %v814_v2  ;;  %v819_v7 = vld [vmem:[%s1140_s1 + $0x18] sm:$0xff]   ;;  %v821_v9 = vld [vmem:[%s1140_s1 + $0x20] sm:$0xff]   ;;  %v822_v10 = vld [vmem:[%s1140_s1 + $0x68] sm:$0xff]  }
  0x3a   :  { %v85_v11 = vld [vmem:[%s1139_s0 + $0x8] sm:$0xff]  ;;  %v824_v14 = vld [vmem:[%s1140_s1 + $0x70] sm:$0xff]   ;;  %v826_v16 = vld [vmem:[%s1140_s1 + $0x78] sm:$0xff]  }
  0x3b   :  { %v87_v12 = vpack.c.bf16 %v85_v11, %v85_v11  ;;  %v823_v13 = vld [vmem:[%s1140_s1 + $0x28] sm:$0xff]   ;;  %v825_v15 = vld [vmem:[%s1140_s1 + $0x30] sm:$0xff]   ;;  %v827_v17 = vld [vmem:[%s1140_s1 + $0x38] sm:$0xff]  }
  0x3c   :  { %729 = vmatpush3.bf16.msra.mxu0 %v815_v3  ;;  %v84_v18 = vld [vmem:[%s1139_s0] sm:$0xff]  ;;  %v270_v21 = vld [vmem:[%s1142_s3 + $0x8] sm:$0xff]  ;;  %v271_v24 = vld [vmem:[%s1142_s3 + $0x10] sm:$0xff] }
  0x3d   :  { %730 = vmatprep.subr.bf16.mxu0 %v816_v4  ;;  %260 = vmatprep.mubr.bf16.mxu0 %v87_v12  ;;  %v86_v19 = vpack.c.bf16 %v84_v18, %v84_v18  ;;  %v269_v20 = vld [vmem:[%s1142_s3] sm:$0xff]  ;;  %v272_v25 = vld [vmem:[%s1142_s3 + $0x18] sm:$0xff]  ;;  %v355_v37 = vld [vmem:[#allocation4 + $0x8] sm:$0xff]  ;;  %v606_v4 = vlaneseq }
  0x3e   :  { %v792_v22 = vpack.c.bf16 %v270_v21, %v269_v20  ;;  %v795_v26 = vpack.c.bf16 %v272_v25, %v271_v24  ;;  %v696_v29 = vld [vmem:[#allocation2] ss:$0 sm:$0xff]  ;;  %v354_v36 = vld [vmem:[#allocation4] sm:$0xff]  ;;  %v518_v49 = vld [vmem:[#allocation6] sm:$0xff] }
  0x3f   :  { %v798_v38 = vpack.c.bf16 %v355_v37, %v354_v36  ;;  %v713_v39 = vld [vmem:[%s1143_s4] ss:$0 sm:$0xff]  ;;  %v830_v52 = vld [vmem:[%s1150_s11 + $0x4] ss:$8 sps:$4 sm:$0xff]   ;;  %v833_v59 = vld [vmem:[%s1150_s11 + $0x14] ss:$8 sps:$4 sm:$0xff]  }
  0x40   :  { %731 = vmatpush3.bf16.msra.mxu0 %v817_v5  ;;  %793 = vmatpush3.bf16.msra.mxu1 %v792_v22  ;;  %v436_v44 = vld [vmem:[%s1146_s7] sm:$0xff]  ;;  %v831_v60 = vld [vmem:[%s1150_s11 + $0x10] ss:$8 sps:$4 sm:$0xff]   ;;  %v607_v5 = vshrl.u32 %v606_v4, 7 }
  0x41   :  { %732 = vmatprep.subr.bf16.mxu0 %v818_v6  ;;  %794 = vmatprep.subr.bf16.mxu1 %v913_v23  ;;  %v715_v45 = vld [vmem:[%s1145_s6] ss:$0 sm:$0xff] }
  0x42   :  { %v519_v50 = vld [vmem:[#allocation6 + $0x8] sm:$0xff]  ;;  %v608_v6 = vsub.s32 0, %v607_v5 }
  0x43   :  { %v801_v51 = vpack.c.bf16 %v519_v50, %v518_v49  ;;  %v717_v53 = vld [vmem:[%s1147_s8] ss:$0 sm:$0xff] }
  0x44   :  { %733 = vmatpush3.bf16.msra.mxu0 %v819_v7  ;;  %796 = vmatpush3.bf16.msra.mxu1 %v795_v26  ;;  %v828_v57 = vld [vmem:[%s1150_s11] ss:$8 sps:$4 sm:$0xff]  }
  0x45   :  { %734 = vmatprep.subr.bf16.mxu0 %v820_v8  ;;  %797 = vmatprep.subr.bf16.mxu1 %v913_v23  ;;  %v719_v62 = vld [vmem:[%s1149_s10] ss:$0 sm:$0xff]  ;;  %v612_v8 = vsub.s32 1, %v607_v5 }
  0x46   :  { %v93_v7 = vld [vmem:[%s1151_s12] sm:$0x3] }
  0x48   :  { %735 = vmatpush3.bf16.msra.mxu0 %v821_v9  ;;  %v609_v9 = vrot.slane %v93_v7, %v608_v6 }
  0x49   :  { %736 = vmatprep.subr.bf16.mxu0 %v822_v10  ;;  %v613_v10 = vrot.slane %v93_v7, %v612_v8 }
  0x4c   :  { %737 = vmatpush3.bf16.msra.mxu0 %v823_v13 }
  0x4d   :  { %738 = vmatprep.subr.bf16.mxu0 %v824_v14 }
  0x50   :  { %739 = vmatpush3.bf16.msra.mxu0 %v825_v15 }
  0x51   :  { %740 = vmatprep.subr.bf16.mxu0 %v826_v16 }
  0x54   :  { %741 = vmatpush3.bf16.msra.mxu0 %v827_v17 }
  0x57   :  { %261 = vmatmul.mubr.bf16.vlgmr.msra.gmra.mrb[0].mxu0 %v86_v19 }
 0x12a   :  { %v742_v28 = vpop.f32.mrb[0].mxu0 }
 0x12b   :  { %v743_v30 = vpop.f32.mrb[1].mxu0 }
 0x12c   :  { %v744_v31 = vadd.f32 %v743_v30, %v742_v28  ;;  %v745_v32 = vpop.f32.mrb[2].mxu0 }
 0x12d   :  { %v746_v33 = vpop.f32.mrb[3].mxu0 }
 0x12e   :  { %v263_v34 = vadd.f32 %v744_v31, %v696_v29 }
 0x130   :  { %v268_v35 = vmax.f32 %v263_v34, 0.0 }
 0x132   :  { %770 = vmatmul.mubr.msk.f32.vlgmr.msra.gmra.mrb[0].mxu1 %vm279_vm1, %v268_v35 }
 0x133   :  { %776 = vmatprep.mubr.msk.f32.mxu1 %vm914_vm0, %v915_v27  ;;  %799 = vmatpush3.bf16.msra.mxu1 %v798_v38 }
 0x134   :  { %779 = vmatprep.subr.mxu1 %v915_v27 }
 0x205   :  { %v349_v40 = vpop.f32.mrb[0].mxu1 }
 0x206   :  { %v350_v41 = vadd.f32 %v713_v39, %v349_v40  ;;  %v771_v42 = vpop.f32.mrb[1].mxu1 }
 0x208   :  { %v353_v43 = vmax.f32 %v350_v41, 0.0 }
 0x20a   :  { %777 = vmatmul.mubr.msk.f32.vlgmr.msra.gmra.mrb[2].mxu1 %vm362_vm2, %v353_v43 }
 0x20b   :  { %780 = vmatpush3.msra.mxu1 %v436_v44  ;;  %781 = vmatprep.mubr.msk.f32.mxu1 %vm914_vm0, %v915_v27 }
 0x20c   :  { %800 = vmatprep.subr.bf16.mxu1 %v913_v23 }
 0x2dd   :  { %v432_v46 = vpop.f32.mrb[2].mxu1 }
 0x2de   :  { %v433_v47 = vadd.f32 %v715_v45, %v432_v46  ;;  %v778_v48 = vpop.f32.mrb[3].mxu1 }
 0x2e0   :  { %782 = vmatmul.mubr.msk.f32.vlgmr.msra.gmra.mrb[4].mxu1 %vm443_vm3, %v433_v47 }
 0x2e1   :  { %788 = vmatprep.mubr.msk.f32.mxu1 %vm914_vm0, %v915_v27  ;;  %802 = vmatpush3.bf16.msra.mxu1 %v801_v51 }
 0x2e2   :  { %639 = vmatprep.subr.bf16.mxu1 %v830_v52 }
 0x3b3   :  { %v513_v54 = vpop.f32.mrb[4].mxu1 }
 0x3b4   :  { %v514_v55 = vadd.f32 %v717_v53, %v513_v54  ;;  %v783_v56 = vpop.f32.mrb[5].mxu1 }
 0x3b6   :  { %v517_v58 = vmax.f32 %v514_v55, 0.0 }
 0x3b8   :  { %789 = vmatmul.mubr.msk.f32.vlgmr.msra.gmra.mrb[6].mxu1 %vm362_vm2, %v517_v58 }
 0x3b9   :  { %640 = vmatpush1.bf16.msra.mxu1 %v828_v57  ;;  %671 = vmatprep.mubr.bf16.mxu1 %v916_v61 }
 0x3ba   :  { %641 = vmatprep.subr.bf16.mxu1 %v833_v59 }
 0x3bd   :  { %642 = vmatpush1.bf16.msra.mxu1 %v831_v60 }
 0x48b   :  { %v595_v63 = vpop.f32.mrb[6].mxu1 }
 0x48c   :  { %v596_v0 = vadd.f32 %v719_v62, %v595_v63  ;;  %v790_v1 = vpop.f32.mrb[7].mxu1 }
 0x48e   :  { %v599_v2 = vmax.f32 %v596_v0, 0.0 }
 0x490   :  { %v600_v3 = vpack.c.bf16 %v599_v2, %v599_v2 }
 0x492   :  { %725 = vmatmul.mubr.msk.bf16.vlgmr.msra.gmra.mrb[8].mxu1 %vm279_vm1, %v600_v3 }
 0x565   :  { %v673_v11 = vpop.f32.mrb[8].mxu1 }
 0x566   :  { %v674_v12 = vadd.f32 %v673_v11, %v609_v9  ;;  %v675_v13 = vpop.f32.mrb[9].mxu1 }
 0x567   :  { %v676_v14 = vadd.f32 %v675_v13, %v613_v10  ;;  %v677_v15 = vpop.f32.mrb[10].mxu1 }
 0x568   :  { %v680_v16 = vmul.f32 0.5, %v674_v12  ;;  %v678_v17 = vpop.f32.mrb[11].mxu1 }
 0x569   :  { %v681_v18 = vmul.f32 0.5, %v676_v14 }
 0x56a   :  { %834 = vtanh.f32 %v680_v16 }
 0x56b   :  { %836 = vtanh.f32 %v681_v18 }
 0x574   :  { %v835_v19 = vpop.eup %834 }
 0x575   :  { %v837_v20 = vpop.eup %836  ;;  %v684_v21 = vmul.f32 0.5, %v835_v19 }
 0x576   :  { %v685_v22 = vmul.f32 0.5, %v837_v20 }
 0x577   :  { %v686_v23 = vadd.f32 0.5, %v684_v21 }
 0x578   :  { %v687_v24 = vadd.f32 0.5, %v685_v22 }
 0x579   :  { %688 = vst [vmem:[%s1152_s13] sm:$0xff] %v686_v23 }
 0x57a   :  { %689 = vst [vmem:[%s1152_s13 + $0x8] sm:$0xff] %v687_v24 }
 0x57b   :  { %694 = vsyncpa [#allocation3], 1 }
 0x57c   :  { %695 = vsyncpa [#allocation5], 1 }

</bundles_post_ra>
